<compile_context>
chip_gen: v7x
topology: tpu7x:2x2x1
jax: 0.10.0
libtpu: 0.0.40
codegen_flags: <defaults>
</compile_context>

<pallas_src>
import functools
import math

import jax
import jax.numpy as jnp
from jax.experimental import pallas as pl
from jax.experimental.pallas import tpu as pltpu


# ----------------------------------------------------------------------------
# Kernel
# ----------------------------------------------------------------------------
def _layernorm_kernel(alpha_ref, bias_ref, x_ref, o_ref, *, eps: float, d: int):
    """Normalise each row of the (tile_rows, d) block over its last axis."""
    x = x_ref[...].astype(jnp.float32)                       # (tr, d)

    # Hoisted scalar reads (SMEM).
    alpha = alpha_ref[0]
    bias = bias_ref[0]

    inv_d = 1.0 / d
    # torch.std default is unbiased (ddof = 1).  d == 1 would be 0/0 (NaN) in
    # PyTorch; we guard the denominator to avoid inf (documented difference).
    inv_dm1 = 1.0 / max(d - 1, 1)

    # Two-pass centered variance (numerically stable), f32 accumulation.
    mean = jnp.sum(x, axis=-1, keepdims=True) * inv_d        # (tr, 1)
    centered = x - mean
    var = jnp.sum(centered * centered, axis=-1, keepdims=True) * inv_dm1
    std = jnp.sqrt(var)                                      # (tr, 1)

    # Per-row approx reciprocal -> EUP slot (free in a mem-bound kernel);
    # eps > 0 already guards the denominator.  Fold alpha into the scale.
    inv = pl.reciprocal(std + eps, approx=True)              # (tr, 1)
    scale = alpha * inv                                      # (tr, 1)

    o_ref[...] = (centered * scale + bias).astype(o_ref.dtype)


# ----------------------------------------------------------------------------
# Tile selection helpers
# ----------------------------------------------------------------------------
def _round_up(n: int, m: int) -> int:
    return ((n + m - 1) // m) * m


def _num_tensorcores() -> int:
    """Best-effort TensorCores-per-device (2 on v7x, 1 on v5e/v6e)."""
    try:
        dev = jax.devices()[0]
        if dev.platform != "tpu":
            return 1
        for attr in ("num_cores", "core_count"):
            v = getattr(dev, attr, None)
            if isinstance(v, int) and 1 <= v <= 8:
                return v
        kind = str(getattr(dev, "device_kind", "")).lower()
        if "v7" in kind:
            return 2
    except Exception:  # pragma: no cover - defensive only
        pass
    return 1


def _choose_tile_rows(rows: int, d: int, in_dtype, num_cores: int,
                      vmem_budget: int = 24 << 20) -> int:
    """Largest dtype-aligned row tile whose live VMEM footprint
    (2x double-buffered input + 2x double-buffered output + ~2 tile-sized f32
    temps held by the compiler) fits in `vmem_budget`.  On multi-TC chips we
    additionally cap the tile so there are ~4 blocks per core (pipelining +
    megacore sharding), but never below ~256 rows (grid-step overhead)."""
    in_b = jnp.dtype(in_dtype).itemsize
    pack = max(8, 32 // max(in_b, 1))        # sublane pack: 8/f32, 16/bf16, 32/int8
    if rows <= pack:
        return rows                           # single full block (equal-dims rule)

    per_row_bytes = d * (4 * in_b + 2 * 4)    # 2*in + 2*out + 2 f32 temps
    budget_rows = max(pack, (vmem_budget // per_row_bytes) // pack * pack)

    tr = min(budget_rows, _round_up(rows, pack))

    if num_cores >= 2:
        target_blocks = 4 * num_cores         # ~4 blocks per TensorCore
        split = _round_up(-(-rows // target_blocks), pack)
        floor = min(budget_rows, max(pack, 256))
        tr = min(tr, max(split, floor))

    if tr >= rows:
        tr = rows                             # equal to full dim -> no padding
    return int(tr)


# ----------------------------------------------------------------------------
# Wrapper
# ----------------------------------------------------------------------------
def layer_normalisation(x, alpha, bias, *, eps: float = 1e-6,
                        tile_rows: int | None = None):
    """x: [..., d_model].  alpha, bias: shape (1,) scalar params."""
    orig_shape = x.shape
    d = orig_shape[-1]
    rows = int(math.prod(orig_shape[:-1])) if len(orig_shape) > 1 else 1
    x2 = x.reshape(rows, d)

    if tile_rows is None:
        tile_rows = _choose_tile_rows(rows, d, x.dtype, _num_tensorcores())

    grid = (pl.cdiv(rows, tile_rows),)

    in_b = jnp.dtype(x.dtype).itemsize
    live_bytes = tile_rows * d * (4 * in_b + 2 * 4)
    # Explicit scoped-VMEM limit: raises v5e's 16 MiB default, stays well
    # under v7x's 64 MiB physical.
    vmem_limit = int(min(48 << 20, max(32 << 20, live_bytes + (4 << 20))))

    cost = pl.CostEstimate(
        flops=5 * rows * d,
        transcendentals=2 * rows,
        bytes_accessed=2 * rows * d * in_b,
    )

    out = pl.pallas_call(
        functools.partial(_layernorm_kernel, eps=eps, d=d),
        out_shape=jax.ShapeDtypeStruct((rows, d), x.dtype),
        grid_spec=pltpu.PrefetchScalarGridSpec(
            num_scalar_prefetch=0,
            grid=grid,
            in_specs=[
                pl.BlockSpec(memory_space=pltpu.MemorySpace.SMEM),   # alpha (1,)
                pl.BlockSpec(memory_space=pltpu.MemorySpace.SMEM),   # bias  (1,)
                pl.BlockSpec((tile_rows, d), lambda i: (i, 0)),      # x tile
            ],
            out_specs=pl.BlockSpec((tile_rows, d), lambda i: (i, 0)),
        ),
        compiler_params=pltpu.CompilerParams(
            dimension_semantics=("parallel",),
            vmem_limit_bytes=vmem_limit,
        ),
        cost_estimate=cost,
    )(alpha.astype(jnp.float32), bias.astype(jnp.float32), x2)

    return out.reshape(orig_shape)


class Decoder:
    """JAX/Pallas port of the PyTorch `Decoder`.

    `layers` is a list of callables with signature
    layer(x, encoder_output, src_mask, trg_mask) -> x, mirroring the
    nn.ModuleList contract.  The module itself only defines the final
    LayerNormalisation, which runs in the Pallas kernel.
    """

    def __init__(self, layers=(), eps: float = 1e-6):
        self.layers = list(layers)
        self.eps = eps
        # LayerNormalisation parameters: alpha = ones(1), bias = zeros(1).
        self.alpha = jnp.ones((1,), dtype=jnp.float32)
        self.bias = jnp.zeros((1,), dtype=jnp.float32)

    def __call__(self, x, encoder_output, src_mask, trg_mask):
        # TODO(synk): the decoder layers are user-supplied in the reference
        # module (nn.ModuleList, not defined there); applied as plain callables.
        for layer in self.layers:
            x = layer(x, encoder_output, src_mask, trg_mask)
        return layer_normalisation(x, self.alpha, self.bias, eps=self.eps)


def _reference_layernorm(x, alpha, bias, eps):
    d = x.shape[-1]
    mean = x.mean(axis=-1, keepdims=True)
    std = jnp.sqrt(jnp.sum((x - mean) ** 2, axis=-1, keepdims=True) / (d - 1))
    return alpha * (x - mean) / (std + eps) + bias


if __name__ == "__main__":
    key = jax.random.PRNGKey(0)
    k1, k2, k3, k4 = jax.random.split(key, 4)

    # Tolerances are loose-ish because the kernel uses the EUP approx
    # reciprocal (per perf review); values after layernorm are O(1).
    ATOL = RTOL = 1e-2

    # 1) Small toy shape consistent with the module interface.
    batch, seq, d_model = 2, 8, 32
    x = jax.random.normal(k1, (batch, seq, d_model), dtype=jnp.float32)
    encoder_output = jax.random.normal(k2, (batch, seq, d_model), dtype=jnp.float32)
    src_mask = jnp.ones((batch, 1, 1, seq), dtype=jnp.float32)
    trg_mask = jnp.ones((batch, 1, seq, seq), dtype=jnp.float32)

    decoder = Decoder(layers=[])  # deterministic: no hidden-layer params needed
    out = jax.block_until_ready(decoder(x, encoder_output, src_mask, trg_mask))
    ref = _reference_layernorm(x, 1.0, 0.0, 1e-6)
    assert out.shape == (batch, seq, d_model)
    assert jnp.allclose(out, ref, atol=ATOL, rtol=RTOL)

    # 2) Lane-dense shape (d % 128 == 0) exercising the bigger-tile path.
    x2 = jax.random.normal(k3, (2, 64, 256), dtype=jnp.float32)
    out2 = jax.block_until_ready(
        layer_normalisation(x2, decoder.alpha, decoder.bias, eps=decoder.eps))
    ref2 = _reference_layernorm(x2, 1.0, 0.0, 1e-6)
    assert jnp.allclose(out2, ref2, atol=ATOL, rtol=RTOL)

    # 3) Non-divisible rows with a forced small tile: exercises the masked
    #    partial last block (rows = 120, tile_rows = 32 -> 4 blocks, last=24).
    x3 = jax.random.normal(k4, (3, 40, 128), dtype=jnp.float32)
    out3 = jax.block_until_ready(
        layer_normalisation(x3, decoder.alpha, decoder.bias,
                            eps=decoder.eps, tile_rows=32))
    ref3 = _reference_layernorm(x3, 1.0, 0.0, 1e-6)
    assert jnp.allclose(out3, ref3, atol=ATOL, rtol=RTOL)

    print("KERNEL_OK")
</pallas_src>

<mosaic_0001>
module attributes {stable_mosaic.version = 11 : i64} {
  func.func @_layernorm_kernel(%arg0: i32, %arg1: memref<1xf32, #tpu.memory_space<smem>>, %arg2: memref<1xf32, #tpu.memory_space<smem>>, %arg3: memref<16x32xf32, #tpu.memory_space<vmem>>, %arg4: memref<16x32xf32, #tpu.memory_space<vmem>>) attributes {dimension_semantics = [#tpu.dimension_semantics<parallel>], iteration_bounds = array<i64: 1>, scalar_prefetch = 0 : i64, scratch_operands = 0 : i64, tpu.core_type = #tpu.core_type<tc>, window_params = [{transform_indices = @transform_0, window_bounds = array<i64: 1>}, {transform_indices = @transform_1, window_bounds = array<i64: 1>}, {transform_indices = @transform_2, window_bounds = array<i64: 16, 32>}, {transform_indices = @transform_3, window_bounds = array<i64: 16, 32>}]} {
    %c0 = arith.constant 0 : index
    %c0_0 = arith.constant 0 : index
    %0 = vector.load %arg3[%c0, %c0_0] : memref<16x32xf32, #tpu.memory_space<vmem>>, vector<16x32xf32>
    %c0_1 = arith.constant 0 : index
    %1 = memref.load %arg1[%c0_1] : memref<1xf32, #tpu.memory_space<smem>>
    %c0_2 = arith.constant 0 : index
    %2 = memref.load %arg2[%c0_2] : memref<1xf32, #tpu.memory_space<smem>>
    %cst = arith.constant dense<0.000000e+00> : vector<16xf32>
    %3 = vector.multi_reduction <add>, %0, %cst [1] : vector<16x32xf32> to vector<16xf32>
    %4 = vector.shape_cast %3 : vector<16xf32> to vector<16x1xf32>
    %cst_3 = arith.constant 3.125000e-02 : f32
    %5 = vector.broadcast %cst_3 : f32 to vector<16x1xf32>
    %6 = arith.mulf %4, %5 : vector<16x1xf32>
    %7 = vector.broadcast %6 : vector<16x1xf32> to vector<16x32xf32>
    %8 = arith.subf %0, %7 : vector<16x32xf32>
    %9 = arith.mulf %8, %8 : vector<16x32xf32>
    %cst_4 = arith.constant dense<0.000000e+00> : vector<16xf32>
    %10 = vector.multi_reduction <add>, %9, %cst_4 [1] : vector<16x32xf32> to vector<16xf32>
    %11 = vector.shape_cast %10 : vector<16xf32> to vector<16x1xf32>
    %cst_5 = arith.constant 0.0322580636 : f32
    %12 = vector.broadcast %cst_5 : f32 to vector<16x1xf32>
    %13 = arith.mulf %11, %12 : vector<16x1xf32>
    %14 = math.sqrt %13 : vector<16x1xf32>
    %cst_6 = arith.constant 9.99999997E-7 : f32
    %15 = vector.broadcast %cst_6 : f32 to vector<16x1xf32>
    %16 = arith.addf %14, %15 : vector<16x1xf32>
    %17 = tpu.reciprocal %16 {approx = true} : vector<16x1xf32> -> vector<16x1xf32>
    %18 = vector.broadcast %1 : f32 to vector<16x1xf32>
    %19 = arith.mulf %18, %17 : vector<16x1xf32>
    %20 = vector.broadcast %19 : vector<16x1xf32> to vector<16x32xf32>
    %21 = arith.mulf %8, %20 : vector<16x32xf32>
    %22 = vector.broadcast %2 : f32 to vector<16x32xf32>
    %23 = arith.addf %21, %22 : vector<16x32xf32>
    %c0_7 = arith.constant 0 : index
    %c0_8 = arith.constant 0 : index
    %24 = vector.load %arg4[%c0_7, %c0_8] : memref<16x32xf32, #tpu.memory_space<vmem>>, vector<16x32xf32>
    tpu.vector_store %arg4[%c0_7, %c0_8], %23 {strides = array<i32>} : memref<16x32xf32, #tpu.memory_space<vmem>>, vector<16x32xf32>,
    return
  }
  func.func @transform_0(%arg0: i32) -> i32 {
    %c0_i32 = arith.constant 0 : i32
    %c0_i32_0 = arith.constant 0 : i32
    return %c0_i32 : i32
  }
  func.func @transform_1(%arg0: i32) -> i32 {
    %c0_i32 = arith.constant 0 : i32
    %c0_i32_0 = arith.constant 0 : i32
    return %c0_i32 : i32
  }
  func.func @transform_2(%arg0: i32) -> (i32, i32) {
    %c0_i32 = arith.constant 0 : i32
    %c0_i32_0 = arith.constant 0 : i32
    return %arg0, %c0_i32 : i32, i32
  }
  func.func @transform_3(%arg0: i32) -> (i32, i32) {
    %c0_i32 = arith.constant 0 : i32
    %c0_i32_0 = arith.constant 0 : i32
    return %arg0, %c0_i32 : i32, i32
  }
}

</mosaic_0001>

<bundles_post_ra>
// kernel: tpu_custom_call.1
= control target key start
LH: loop header
LB: loop body
LE: loop exit
PB: predicated region body
PF: predicated region fallthrough
CT: control target
= control target key end

     0   :  { %10 = vsyncpa [#allocation5], 0  ;;  %s227_s0 = inlined_call_operand.<no memory space> [shape: f32[1], index: 0, kind: input, shape index: {}]   ;;  %s228_s1 = inlined_call_operand.<no memory space> [shape: f32[1], index: 1, kind: input, shape index: {}]   ;;  %s229_s2 = inlined_call_operand.hbm [shape: f32[16,32], index: 2, kind: input, shape index: {}]   ;;  %s230_s3 = inlined_call_operand.hbm [shape: f32[16,32], index: 3, kind: output, shape index: {}]  }
   0x1   :  { %11 = vsyncpa [#allocation6], 0  ;;  %s161_s12 = smov [#allocation4]   ;;  %s113_s16 = scalar_lea.hbm %s229_s2, 256 }
   0x2   :  { %s21_s13 = sshll.u32 %s161_s12, 4  ;;  %p114_p0 = scmp.ne.s32.totalorder %s229_s2, %s113_s16  ;;  %s22_s13 = int_to_ptr.vmem [resolvable:$true] %s21_s13 }
   0x3   :  { %p117_p1 = scmp.lt.u32.totalorder %s113_s16, %s229_s2 }
   0x5   :  { %p119_p2 = pnand %p117_p1, %p114_p0 }
   0x7   :  { %122 = shalt.err (!%p119_p2)
}
   0x8   :  { %s123_s21 = scalar_lea.vmem %s22_s13, 256  ;;  %p128_p4 = scmp.lt.s32.totalorder %s22_s13, %s22_s13 }
   0x9   :  { %p124_p3 = scmp.ne.s32.totalorder %s22_s13, %s123_s21  ;;  %p129_p5 = scmp.lt.s32.totalorder %s123_s21, %s123_s21 }
   0xb   :  { %p130_p6 = por %p129_p5, %p128_p4 }
   0xd   :  { %p131_p7 = pnand %p130_p6, %p124_p3 }
   0xf   :  { %134 = shalt.err (!%p131_p7)
}
  0x10   :  { %s162_s22 = smov 128   ;;  %s163_s23 = smov 8  }
  0x11   :  { %27 = dma.hbm_to_vmem [thread:$0]  %s229_s2, 256, %s22_s13, [#allocation5], %s162_s22, %s162_s22, %s163_s23  }
  0x12   :  { %157 = dma.done.wait [#allocation5], 256  }
  0x13   :  { %158 = vsyncadd [#allocation5], 4294967040  ;;  %vm35_vm0 = vcmask 261120   ;;  %v31_v0 = vld [vmem:[#allocation4] sm:$0xff]  ;;  %v32_v1 = vld [vmem:[#allocation4 + $0x8] sm:$0xff]  ;;  %v74_v30 = vstv %s227_s0  ;;  %v79_v33 = vstv %s228_s1  ;;  %s164_s29 = smov [#allocation7]  }
  0x14   :  { %v36_v2 = vsel %vm35_vm0, %v31_v0, 0.0  ;;  %v39_v3 = vsel %vm35_vm0, %v32_v1, 0.0  ;;  %s89_s30 = sshll.u32 %s164_s29, 4  ;;  %s90_s30 = int_to_ptr.vmem [resolvable:$true] %s89_s30 }
  0x15   :  { %37 = vadd.xlane.f32.xlu0 %v36_v2  ;;  %s135_s0 = scalar_lea.vmem %s90_s30, 256  ;;  %p140_p9 = scmp.lt.s32.totalorder %s90_s30, %s90_s30 }
  0x16   :  { %p136_p8 = scmp.ne.s32.totalorder %s90_s30, %s135_s0  ;;  %p141_p10 = scmp.lt.s32.totalorder %s135_s0, %s135_s0 }
  0x18   :  { %p142_p11 = por %p141_p10, %p140_p9 }
  0x19   :  { %40 = vadd.xlane.f32.xlu0 %v39_v3 }
  0x1a   :  { %p143_p12 = pnand %p142_p11, %p136_p8 }
  0xa2   :  { %v38_v4 = vpop.xlane.xlu0 %37 }
  0xa3   :  { %v42_v5 = vmul.f32 0.03125, %v38_v4 }
  0xa5   :  { %v44_v6 = vsub.f32 %v31_v0, %v42_v5 }
  0xa6   :  { %v41_v7 = vpop.xlane.xlu0 %40 }
  0xa7   :  { %v43_v8 = vmul.f32 0.03125, %v41_v7  ;;  %v46_v9 = vmul.f32 %v44_v6, %v44_v6 }
  0xa9   :  { %v45_v10 = vsub.f32 %v32_v1, %v43_v8  ;;  %v48_v11 = vsel %vm35_vm0, %v46_v9, 0.0 }
  0xaa   :  { %49 = vadd.xlane.f32.xlu1 %v48_v11 }
  0xab   :  { %v47_v12 = vmul.f32 %v45_v10, %v45_v10 }
  0xad   :  { %v51_v13 = vsel %vm35_vm0, %v47_v12, 0.0 }
  0xae   :  { %52 = vadd.xlane.f32.xlu1 %v51_v13 }
 0x137   :  { %v50_v14 = vpop.xlane.xlu1 %49 }
 0x138   :  { %v54_v15 = vmul.f32 0.032258064, %v50_v14 }
 0x13a   :  { %105 = vrsqrt.f32 %v54_v15  ;;  %vm58_vm1 = vcmp.eq.f32.partialorder %v54_v15, inf  ;;  %v61_v20 = vand.u32 2147483648, %v54_v15  ;;  %vm60_vm2 = vcmp.eq.f32.partialorder %v54_v15, 0.0 }
 0x13b   :  { %v53_v16 = vpop.xlane.xlu1 %52 }
 0x13c   :  { %v55_v17 = vmul.f32 0.032258064, %v53_v16 }
 0x13e   :  { %107 = vrsqrt.f32 %v55_v17  ;;  %vm65_vm3 = vcmp.eq.f32.partialorder %v55_v17, inf  ;;  %v68_v26 = vand.u32 2147483648, %v55_v17  ;;  %vm67_vm4 = vcmp.eq.f32.partialorder %v55_v17, 0.0 }
 0x144   :  { %v106_v18 = vpop.eup %105 }
 0x145   :  { %v57_v19 = vmul.f32 %v106_v18, %v54_v15 }
 0x147   :  { %v59_v21 = vsel %vm58_vm1, %v54_v15, %v57_v19 }
 0x148   :  { %v108_v22 = vpop.eup %107  ;;  %v62_v23 = vsel %vm60_vm2, %v61_v20, %v59_v21 }
 0x149   :  { %v70_v24 = vadd.f32 1e-06, %v62_v23  ;;  %v64_v25 = vmul.f32 %v108_v22, %v55_v17 }
 0x14b   :  { %109 = vrcp.f32 %v70_v24  ;;  %v66_v27 = vsel %vm65_vm3, %v55_v17, %v64_v25 }
 0x14c   :  { %v69_v28 = vsel %vm67_vm4, %v68_v26, %v66_v27 }
 0x14d   :  { %v71_v29 = vadd.f32 1e-06, %v69_v28 }
 0x14f   :  { %111 = vrcp.f32 %v71_v29 }
 0x155   :  { %v110_v31 = vpop.eup %109 }
 0x156   :  { %v75_v32 = vmul.f32 %v110_v31, %v74_v30 }
 0x158   :  { %v77_v34 = vmul.f32 %v75_v32, %v44_v6 }
 0x159   :  { %v112_v35 = vpop.eup %111 }
 0x15a   :  { %v76_v36 = vmul.f32 %v112_v35, %v74_v30  ;;  %v80_v37 = vadd.f32 %v79_v33, %v77_v34 }
 0x15c   :  { %v78_v38 = vmul.f32 %v76_v36, %v45_v10  ;;  %82 = vst.msk [vmem:[#allocation7] sm:$0xff] %vm35_vm0, %v80_v37 }
 0x15e   :  { %v81_v39 = vadd.f32 %v79_v33, %v78_v38 }
 0x160   :  { %83 = vst.msk [vmem:[#allocation7 + $0x8] sm:$0xff] %vm35_vm0, %v81_v39 }
 0x161   :  { %146 = shalt.err (!%p143_p12)
}
 0x162   :  { %s147_s5 = scalar_lea.hbm %s230_s3, 256 }
 0x163   :  { %p148_p13 = scmp.ne.s32.totalorder %s230_s3, %s147_s5  ;;  %p151_p0 = scmp.lt.u32.totalorder %s147_s5, %s230_s3 }
 0x165   :  { %p153_p1 = pnand %p151_p0, %p148_p13 }
 0x167   :  { %156 = shalt.err (!%p153_p1)
}
 0x168   :  { %95 = dma.vmem_to_hbm [thread:$0]  %s90_s30, 256, %s230_s3, [#allocation6], %s162_s22, %s162_s22, %s163_s23  }
 0x169   :  { %159 = dma.done.wait [#allocation6], 256  }
 0x16a   :  { %160 = vsyncadd [#allocation6], 4294967040 }
 0x16b   :  { %99 = vsyncpa [#allocation5], 1 }
 0x16c   :  { %100 = vsyncpa [#allocation6], 1 }

</bundles_post_ra>
